<compile_context>
chip_gen: v7x
topology: tpu7x:2x2x1
jax: 0.10.0
libtpu: 0.0.40
codegen_flags: <defaults>
</compile_context>

<pallas_src>
import functools

import jax
import jax.numpy as jnp
import numpy as np
from jax.experimental import pallas as pl
from jax.experimental.pallas import tpu as pltpu


def _round_up(n, m):
    return ((n + m - 1) // m) * m


def _decoder_kernel(B, E, H, Gp,
                    tok_ref, emb_ref, ctx_ref, h_ref,
                    wi_ref, wh_ref, bg_ref,
                    w1_ref, b1_ref, w2_ref, b2_ref,
                    pred_ref, hnew_ref,
                    x_scr):
    """Fully fused decoder step: embedding gather + GRU cell + fc_1 + fc_2."""
    EH = E + H

    # ---- Fused embedding gather: x = [relu(emb[tok]) | ctx] built in VMEM.
    # Token ids are scalars in SMEM; each embedding row is a dynamic-sublane
    # load from the VMEM table.  B is small and static -> unrolled.
    for i in range(B):
        tok = tok_ref[i]
        row = emb_ref[pl.ds(tok, 1), :]                       # (1, E)
        x_scr[pl.ds(i, 1), 0:E] = jnp.maximum(row, 0.0)       # relu(embedded)
    x_scr[:, E:EH] = ctx_ref[0]                               # context.squeeze(0)

    x = x_scr[...]                                            # (B, E+H)
    h = h_ref[0]                                              # (B, H)

    # ---- GRU gates.  Gates are packed on 128-lane-aligned blocks
    # (gate g occupies lanes [g*Gp, g*Gp+H)), so every slice below starts on a
    # vreg boundary -> no cross-lane shuffles.
    gx = jnp.dot(x, wi_ref[...], preferred_element_type=jnp.float32)   # (B, 3*Gp)
    gh = jnp.dot(h, wh_ref[...], preferred_element_type=jnp.float32)   # (B, 3*Gp)

    r = jax.nn.sigmoid(gx[:, 0:H] + gh[:, 0:H] + bg_ref[0:1, 0:H])
    z = jax.nn.sigmoid(gx[:, Gp:Gp + H] + gh[:, Gp:Gp + H]
                       + bg_ref[0:1, Gp:Gp + H])
    n = jnp.tanh(gx[:, 2 * Gp:2 * Gp + H] + bg_ref[0:1, 2 * Gp:2 * Gp + H]
                 + r * (gh[:, 2 * Gp:2 * Gp + H] + bg_ref[1:2, 2 * Gp:2 * Gp + H]))
    h_new = (1.0 - z) * n + z * h                             # (B, H)

    # ---- fc_1 on concat([emb, h_new, ctx]); w1 rows prepacked as
    # [emb | ctx ; h_new] so x feeds the first EH rows and h_new the rest.
    o = (jnp.dot(x, w1_ref[0:EH, :], preferred_element_type=jnp.float32)
         + jnp.dot(h_new, w1_ref[EH:, :], preferred_element_type=jnp.float32)
         + b1_ref[...])
    o = jnp.maximum(o, 0.0)                                   # F.relu(fc_1(...))

    # ---- fc_2 (vocab columns zero-padded to a multiple of 128 -> unmasked vst).
    pred = jnp.dot(o, w2_ref[...], preferred_element_type=jnp.float32) + b2_ref[...]

    pred_ref[...] = pred                                      # (B, Vp) lane-dense
    hnew_ref[0] = h_new                                       # aliases hidden in place


def pack_params(params):
    """One-time repack of PyTorch-layout params into the fused kernel layout."""
    E = params["emb_table"].shape[1]
    H = params["whr"].shape[0]
    V = params["w2"].shape[1]
    Gp = _round_up(H, 128)       # per-gate 128-lane-aligned block
    Vp = _round_up(V, 128)       # lane-dense logits

    def pad_g(a):                # pad gate columns H -> Gp
        return jnp.pad(a, ((0, 0), (0, Gp - H)))

    wi = jnp.concatenate([pad_g(params["wir"]), pad_g(params["wiz"]),
                          pad_g(params["win"])], axis=1)                  # (E+H, 3*Gp)
    wh = jnp.concatenate([pad_g(params["whr"]), pad_g(params["whz"]),
                          pad_g(params["whn"])], axis=1)                  # (H, 3*Gp)

    bg_row0 = jnp.concatenate([pad_g(params["bir"] + params["bhr"]),
                               pad_g(params["biz"] + params["bhz"]),
                               pad_g(params["binn"])], axis=1)            # (1, 3*Gp)
    bg_row1 = jnp.concatenate([jnp.zeros((1, 2 * Gp), jnp.float32),
                               pad_g(params["bhn"])], axis=1)             # (1, 3*Gp)
    bg = jnp.concatenate([bg_row0, bg_row1], axis=0)                      # (2, 3*Gp)

    # fc_1 rows reordered to [emb rows, ctx rows, h_new rows].
    w1 = params["w1"]
    w1p = jnp.concatenate([w1[:E], w1[E + H:], w1[E:E + H]], axis=0)      # (E+2H, 256)

    w2p = jnp.pad(params["w2"], ((0, 0), (0, Vp - V)))                    # (256, Vp)
    b2p = jnp.pad(params["b2"], ((0, 0), (0, Vp - V)))                    # (1, Vp)

    return {"emb_table": params["emb_table"], "wi": wi, "wh": wh, "bg": bg,
            "w1p": w1p, "b1": params["b1"], "w2p": w2p, "b2p": b2p,
            "E": E, "H": H, "Gp": Gp, "V": V, "Vp": Vp}


def decoder_forward(packed, tokens, hidden, context):
    """tokens: (B,) int32; hidden: (1, B, H); context: (1, B, H)."""
    B = tokens.shape[0]
    E, H, Gp, V, Vp = packed["E"], packed["H"], packed["Gp"], packed["V"], packed["Vp"]

    kernel = functools.partial(_decoder_kernel, B, E, H, Gp)
    ins = (tokens.astype(jnp.int32), packed["emb_table"], context, hidden,
           packed["wi"], packed["wh"], packed["bg"],
           packed["w1p"], packed["b1"], packed["w2p"], packed["b2p"])

    smem = pl.BlockSpec(memory_space=pltpu.MemorySpace.SMEM)
    vmem = pl.BlockSpec(memory_space=pltpu.MemorySpace.VMEM)
    pred_p, h_new = pl.pallas_call(
        kernel,
        out_shape=(jax.ShapeDtypeStruct((B, Vp), jnp.float32),
                   jax.ShapeDtypeStruct((1, B, H), jnp.float32)),
        in_specs=[smem] + [vmem] * (len(ins) - 1),
        out_specs=(vmem, vmem),
        scratch_shapes=[pltpu.VMEM((B, E + H), jnp.float32)],   # x = [relu(emb)|ctx]
        input_output_aliases={3: 1},                            # hidden updated in place
    )(*ins)
    return pred_p[:, :V], h_new          # strip vocab pad; hidden already (1, B, H)


def reference_forward(params, tokens, hidden, context):
    """Pure-JAX reference mirroring the PyTorch forward (unpacked params)."""
    emb = jnp.maximum(jnp.take(params["emb_table"], tokens, axis=0), 0.0)
    ctx = context[0]
    h = hidden[0]
    x = jnp.concatenate([emb, ctx], axis=1)
    r = jax.nn.sigmoid(x @ params["wir"] + params["bir"] + h @ params["whr"] + params["bhr"])
    z = jax.nn.sigmoid(x @ params["wiz"] + params["biz"] + h @ params["whz"] + params["bhz"])
    n = jnp.tanh(x @ params["win"] + params["binn"] + r * (h @ params["whn"] + params["bhn"]))
    h_new = (1.0 - z) * n + z * h
    cat = jnp.concatenate([emb, h_new, ctx], axis=1)
    o = jnp.maximum(cat @ params["w1"] + params["b1"], 0.0)
    pred = o @ params["w2"] + params["b2"]
    return pred, h_new[None]


def init_params(key, output_dim, emb_dim, hid_dim, fc_hidden=256):
    ks = jax.random.split(key, 20)
    s = 0.1
    p = {
        "emb_table": s * jax.random.normal(ks[0], (output_dim, emb_dim), jnp.float32),
        # GRU input->hidden weights, per gate, stored as (emb+hid, hid)
        "wir": s * jax.random.normal(ks[1], (emb_dim + hid_dim, hid_dim), jnp.float32),
        "wiz": s * jax.random.normal(ks[2], (emb_dim + hid_dim, hid_dim), jnp.float32),
        "win": s * jax.random.normal(ks[3], (emb_dim + hid_dim, hid_dim), jnp.float32),
        # GRU hidden->hidden weights, per gate, (hid, hid)
        "whr": s * jax.random.normal(ks[4], (hid_dim, hid_dim), jnp.float32),
        "whz": s * jax.random.normal(ks[5], (hid_dim, hid_dim), jnp.float32),
        "whn": s * jax.random.normal(ks[6], (hid_dim, hid_dim), jnp.float32),
        # GRU biases (kept 2D (1, hid))
        "bir": s * jax.random.normal(ks[7], (1, hid_dim), jnp.float32),
        "biz": s * jax.random.normal(ks[8], (1, hid_dim), jnp.float32),
        "binn": s * jax.random.normal(ks[9], (1, hid_dim), jnp.float32),
        "bhr": s * jax.random.normal(ks[10], (1, hid_dim), jnp.float32),
        "bhz": s * jax.random.normal(ks[11], (1, hid_dim), jnp.float32),
        "bhn": s * jax.random.normal(ks[12], (1, hid_dim), jnp.float32),
        # fc_1: (emb + 2*hid) -> 256 ; fc_2: 256 -> output_dim
        "w1": s * jax.random.normal(ks[13], (emb_dim + 2 * hid_dim, fc_hidden), jnp.float32),
        "b1": s * jax.random.normal(ks[14], (1, fc_hidden), jnp.float32),
        "w2": s * jax.random.normal(ks[15], (fc_hidden, output_dim), jnp.float32),
        "b2": s * jax.random.normal(ks[16], (1, output_dim), jnp.float32),
    }
    return p


if __name__ == "__main__":
    # Shapes implied by the forward: tokens (B,), hidden/context (1, B, H).
    B, E, H, V = 8, 32, 32, 64          # batch, emb_dim, hid_dim, output_dim (vocab)
    key = jax.random.PRNGKey(0)
    kp, kt, kh, kc = jax.random.split(key, 4)

    params = init_params(kp, V, E, H)
    packed = pack_params(params)
    tokens = jax.random.randint(kt, (B,), 0, V, dtype=jnp.int32)
    hidden = jax.random.normal(kh, (1, B, H), jnp.float32)
    context = jax.random.normal(kc, (1, B, H), jnp.float32)

    # NOTE: dropout is defined in the PyTorch module but never applied in forward.
    pred, h_new = decoder_forward(packed, tokens, hidden, context)
    pred = jax.block_until_ready(pred)
    h_new = jax.block_until_ready(h_new)

    pred_ref, h_ref = reference_forward(params, tokens, hidden, context)
    np.testing.assert_allclose(np.asarray(pred), np.asarray(pred_ref), rtol=1e-5, atol=1e-5)
    np.testing.assert_allclose(np.asarray(h_new), np.asarray(h_ref), rtol=1e-5, atol=1e-5)

    assert pred.shape == (B, V) and h_new.shape == (1, B, H)
    print("KERNEL_OK")
</pallas_src>

<mosaic_0001>
module attributes {stable_mosaic.version = 11 : i64} {
  func.func @_decoder_kernel(%arg0: memref<8xi32, #tpu.memory_space<smem>>, %arg1: memref<64x32xf32, #tpu.memory_space<vmem>>, %arg2: memref<1x8x32xf32, #tpu.memory_space<vmem>>, %arg3: memref<1x8x32xf32, #tpu.memory_space<vmem>>, %arg4: memref<64x384xf32, #tpu.memory_space<vmem>>, %arg5: memref<32x384xf32, #tpu.memory_space<vmem>>, %arg6: memref<2x384xf32, #tpu.memory_space<vmem>>, %arg7: memref<96x256xf32, #tpu.memory_space<vmem>>, %arg8: memref<1x256xf32, #tpu.memory_space<vmem>>, %arg9: memref<256x128xf32, #tpu.memory_space<vmem>>, %arg10: memref<1x128xf32, #tpu.memory_space<vmem>>, %arg11: memref<8x128xf32, #tpu.memory_space<vmem>>, %arg12: memref<1x8x32xf32, #tpu.memory_space<vmem>>, %arg13: memref<8x64xf32, #tpu.memory_space<vmem>>) attributes {dimension_semantics = [], scalar_prefetch = 0 : i64, scratch_operands = 1 : i64, tpu.core_type = #tpu.core_type<tc>} {
    %c0 = arith.constant 0 : index
    %0 = memref.load %arg0[%c0] : memref<8xi32, #tpu.memory_space<smem>>
    %1 = arith.index_cast %0 : i32 to index
    %c0_0 = arith.constant 0 : index
    %2 = vector.load %arg1[%1, %c0_0] : memref<64x32xf32, #tpu.memory_space<vmem>>, vector<1x32xf32>
    %cst = arith.constant 0.000000e+00 : f32
    %3 = vector.broadcast %cst : f32 to vector<1x32xf32>
    %4 = arith.maximumf %2, %3 : vector<1x32xf32>
    %c0_1 = arith.constant 0 : index
    %c0_2 = arith.constant 0 : index
    %5 = vector.load %arg13[%c0_1, %c0_2] : memref<8x64xf32, #tpu.memory_space<vmem>>, vector<1x32xf32>
    tpu.vector_store %arg13[%c0_1, %c0_2], %4 {strides = array<i32>} : memref<8x64xf32, #tpu.memory_space<vmem>>, vector<1x32xf32>,
    %c1 = arith.constant 1 : index
    %6 = memref.load %arg0[%c1] : memref<8xi32, #tpu.memory_space<smem>>
    %7 = arith.index_cast %6 : i32 to index
    %c0_3 = arith.constant 0 : index
    %8 = vector.load %arg1[%7, %c0_3] : memref<64x32xf32, #tpu.memory_space<vmem>>, vector<1x32xf32>
    %cst_4 = arith.constant 0.000000e+00 : f32
    %9 = vector.broadcast %cst_4 : f32 to vector<1x32xf32>
    %10 = arith.maximumf %8, %9 : vector<1x32xf32>
    %c1_5 = arith.constant 1 : index
    %c0_6 = arith.constant 0 : index
    %11 = vector.load %arg13[%c1_5, %c0_6] : memref<8x64xf32, #tpu.memory_space<vmem>>, vector<1x32xf32>
    tpu.vector_store %arg13[%c1_5, %c0_6], %10 {strides = array<i32>} : memref<8x64xf32, #tpu.memory_space<vmem>>, vector<1x32xf32>,
    %c2 = arith.constant 2 : index
    %12 = memref.load %arg0[%c2] : memref<8xi32, #tpu.memory_space<smem>>
    %13 = arith.index_cast %12 : i32 to index
    %c0_7 = arith.constant 0 : index
    %14 = vector.load %arg1[%13, %c0_7] : memref<64x32xf32, #tpu.memory_space<vmem>>, vector<1x32xf32>
    %cst_8 = arith.constant 0.000000e+00 : f32
    %15 = vector.broadcast %cst_8 : f32 to vector<1x32xf32>
    %16 = arith.maximumf %14, %15 : vector<1x32xf32>
    %c2_9 = arith.constant 2 : index
    %c0_10 = arith.constant 0 : index
    %17 = vector.load %arg13[%c2_9, %c0_10] : memref<8x64xf32, #tpu.memory_space<vmem>>, vector<1x32xf32>
    tpu.vector_store %arg13[%c2_9, %c0_10], %16 {strides = array<i32>} : memref<8x64xf32, #tpu.memory_space<vmem>>, vector<1x32xf32>,
    %c3 = arith.constant 3 : index
    %18 = memref.load %arg0[%c3] : memref<8xi32, #tpu.memory_space<smem>>
    %19 = arith.index_cast %18 : i32 to index
    %c0_11 = arith.constant 0 : index
    %20 = vector.load %arg1[%19, %c0_11] : memref<64x32xf32, #tpu.memory_space<vmem>>, vector<1x32xf32>
    %cst_12 = arith.constant 0.000000e+00 : f32
    %21 = vector.broadcast %cst_12 : f32 to vector<1x32xf32>
    %22 = arith.maximumf %20, %21 : vector<1x32xf32>
    %c3_13 = arith.constant 3 : index
    %c0_14 = arith.constant 0 : index
    %23 = vector.load %arg13[%c3_13, %c0_14] : memref<8x64xf32, #tpu.memory_space<vmem>>, vector<1x32xf32>
    tpu.vector_store %arg13[%c3_13, %c0_14], %22 {strides = array<i32>} : memref<8x64xf32, #tpu.memory_space<vmem>>, vector<1x32xf32>,
    %c4 = arith.constant 4 : index
    %24 = memref.load %arg0[%c4] : memref<8xi32, #tpu.memory_space<smem>>
    %25 = arith.index_cast %24 : i32 to index
    %c0_15 = arith.constant 0 : index
    %26 = vector.load %arg1[%25, %c0_15] : memref<64x32xf32, #tpu.memory_space<vmem>>, vector<1x32xf32>
    %cst_16 = arith.constant 0.000000e+00 : f32
    %27 = vector.broadcast %cst_16 : f32 to vector<1x32xf32>
    %28 = arith.maximumf %26, %27 : vector<1x32xf32>
    %c4_17 = arith.constant 4 : index
    %c0_18 = arith.constant 0 : index
    %29 = vector.load %arg13[%c4_17, %c0_18] : memref<8x64xf32, #tpu.memory_space<vmem>>, vector<1x32xf32>
    tpu.vector_store %arg13[%c4_17, %c0_18], %28 {strides = array<i32>} : memref<8x64xf32, #tpu.memory_space<vmem>>, vector<1x32xf32>,
    %c5 = arith.constant 5 : index
    %30 = memref.load %arg0[%c5] : memref<8xi32, #tpu.memory_space<smem>>
    %31 = arith.index_cast %30 : i32 to index
    %c0_19 = arith.constant 0 : index
    %32 = vector.load %arg1[%31, %c0_19] : memref<64x32xf32, #tpu.memory_space<vmem>>, vector<1x32xf32>
    %cst_20 = arith.constant 0.000000e+00 : f32
    %33 = vector.broadcast %cst_20 : f32 to vector<1x32xf32>
    %34 = arith.maximumf %32, %33 : vector<1x32xf32>
    %c5_21 = arith.constant 5 : index
    %c0_22 = arith.constant 0 : index
    %35 = vector.load %arg13[%c5_21, %c0_22] : memref<8x64xf32, #tpu.memory_space<vmem>>, vector<1x32xf32>
    tpu.vector_store %arg13[%c5_21, %c0_22], %34 {strides = array<i32>} : memref<8x64xf32, #tpu.memory_space<vmem>>, vector<1x32xf32>,
    %c6 = arith.constant 6 : index
    %36 = memref.load %arg0[%c6] : memref<8xi32, #tpu.memory_space<smem>>
    %37 = arith.index_cast %36 : i32 to index
    %c0_23 = arith.constant 0 : index
    %38 = vector.load %arg1[%37, %c0_23] : memref<64x32xf32, #tpu.memory_space<vmem>>, vector<1x32xf32>
    %cst_24 = arith.constant 0.000000e+00 : f32
    %39 = vector.broadcast %cst_24 : f32 to vector<1x32xf32>
    %40 = arith.maximumf %38, %39 : vector<1x32xf32>
    %c6_25 = arith.constant 6 : index
    %c0_26 = arith.constant 0 : index
    %41 = vector.load %arg13[%c6_25, %c0_26] : memref<8x64xf32, #tpu.memory_space<vmem>>, vector<1x32xf32>
    tpu.vector_store %arg13[%c6_25, %c0_26], %40 {strides = array<i32>} : memref<8x64xf32, #tpu.memory_space<vmem>>, vector<1x32xf32>,
    %c7 = arith.constant 7 : index
    %42 = memref.load %arg0[%c7] : memref<8xi32, #tpu.memory_space<smem>>
    %43 = arith.index_cast %42 : i32 to index
    %c0_27 = arith.constant 0 : index
    %44 = vector.load %arg1[%43, %c0_27] : memref<64x32xf32, #tpu.memory_space<vmem>>, vector<1x32xf32>
    %cst_28 = arith.constant 0.000000e+00 : f32
    %45 = vector.broadcast %cst_28 : f32 to vector<1x32xf32>
    %46 = arith.maximumf %44, %45 : vector<1x32xf32>
    %c7_29 = arith.constant 7 : index
    %c0_30 = arith.constant 0 : index
    %47 = vector.load %arg13[%c7_29, %c0_30] : memref<8x64xf32, #tpu.memory_space<vmem>>, vector<1x32xf32>
    tpu.vector_store %arg13[%c7_29, %c0_30], %46 {strides = array<i32>} : memref<8x64xf32, #tpu.memory_space<vmem>>, vector<1x32xf32>,
    %c0_31 = arith.constant 0 : index
    %c0_32 = arith.constant 0 : index
    %c0_33 = arith.constant 0 : index
    %48 = vector.load %arg2[%c0_31, %c0_32, %c0_33] : memref<1x8x32xf32, #tpu.memory_space<vmem>>, vector<1x8x32xf32>
    %49 = vector.shape_cast %48 : vector<1x8x32xf32> to vector<8x32xf32>
    %c0_34 = arith.constant 0 : index
    %c32 = arith.constant 32 : index
    %50 = vector.load %arg13[%c0_34, %c32] : memref<8x64xf32, #tpu.memory_space<vmem>>, vector<8x32xf32>
    tpu.vector_store %arg13[%c0_34, %c32], %49 {strides = array<i32>} : memref<8x64xf32, #tpu.memory_space<vmem>>, vector<8x32xf32>,
    %c0_35 = arith.constant 0 : index
    %c0_36 = arith.constant 0 : index
    %51 = vector.load %arg13[%c0_35, %c0_36] : memref<8x64xf32, #tpu.memory_space<vmem>>, vector<8x64xf32>
    %c0_37 = arith.constant 0 : index
    %c0_38 = arith.constant 0 : index
    %c0_39 = arith.constant 0 : index
    %52 = vector.load %arg3[%c0_37, %c0_38, %c0_39] : memref<1x8x32xf32, #tpu.memory_space<vmem>>, vector<1x8x32xf32>
    %53 = vector.shape_cast %52 : vector<1x8x32xf32> to vector<8x32xf32>
    %c0_40 = arith.constant 0 : index
    %c0_41 = arith.constant 0 : index
    %54 = vector.load %arg4[%c0_40, %c0_41] : memref<64x384xf32, #tpu.memory_space<vmem>>, vector<64x384xf32>
    %cst_42 = arith.constant dense<0.000000e+00> : vector<8x384xf32>
    %55 = tpu.matmul %51, %54, %cst_42 {dimension_numbers = #tpu.dot_dimension_numbers<[1], [0], [0], [1], [0, 0, 1, 1], [], []>} : vector<8x64xf32>, vector<64x384xf32>, vector<8x384xf32> -> vector<8x384xf32>
    %c0_43 = arith.constant 0 : index
    %c0_44 = arith.constant 0 : index
    %56 = vector.load %arg5[%c0_43, %c0_44] : memref<32x384xf32, #tpu.memory_space<vmem>>, vector<32x384xf32>
    %cst_45 = arith.constant dense<0.000000e+00> : vector<8x384xf32>
    %57 = tpu.matmul %53, %56, %cst_45 {dimension_numbers = #tpu.dot_dimension_numbers<[1], [0], [0], [1], [0, 0, 1, 1], [], []>} : vector<8x32xf32>, vector<32x384xf32>, vector<8x384xf32> -> vector<8x384xf32>
    %58 = vector.extract_strided_slice %55 {offsets = [0, 0], sizes = [8, 32], strides = [1, 1]} : vector<8x384xf32> to vector<8x32xf32>
    %59 = vector.extract_strided_slice %57 {offsets = [0, 0], sizes = [8, 32], strides = [1, 1]} : vector<8x384xf32> to vector<8x32xf32>
    %60 = arith.addf %58, %59 : vector<8x32xf32>
    %c0_46 = arith.constant 0 : index
    %c0_47 = arith.constant 0 : index
    %61 = vector.load %arg6[%c0_46, %c0_47] : memref<2x384xf32, #tpu.memory_space<vmem>>, vector<1x32xf32>
    %62 = vector.broadcast %61 : vector<1x32xf32> to vector<8x32xf32>
    %63 = arith.addf %60, %62 : vector<8x32xf32>
    %64 = arith.negf %63 : vector<8x32xf32>
    %65 = math.exp %64 : vector<8x32xf32>
    %cst_48 = arith.constant 1.000000e+00 : f32
    %66 = vector.broadcast %cst_48 : f32 to vector<8x32xf32>
    %67 = arith.addf %66, %65 : vector<8x32xf32>
    %68 = arith.divf %66, %67 : vector<8x32xf32>
    %69 = vector.extract_strided_slice %55 {offsets = [0, 128], sizes = [8, 32], strides = [1, 1]} : vector<8x384xf32> to vector<8x32xf32>
    %70 = vector.extract_strided_slice %57 {offsets = [0, 128], sizes = [8, 32], strides = [1, 1]} : vector<8x384xf32> to vector<8x32xf32>
    %71 = arith.addf %69, %70 : vector<8x32xf32>
    %c0_49 = arith.constant 0 : index
    %c128 = arith.constant 128 : index
    %72 = vector.load %arg6[%c0_49, %c128] : memref<2x384xf32, #tpu.memory_space<vmem>>, vector<1x32xf32>
    %73 = vector.broadcast %72 : vector<1x32xf32> to vector<8x32xf32>
    %74 = arith.addf %71, %73 : vector<8x32xf32>
    %75 = arith.negf %74 : vector<8x32xf32>
    %76 = math.exp %75 : vector<8x32xf32>
    %cst_50 = arith.constant 1.000000e+00 : f32
    %77 = vector.broadcast %cst_50 : f32 to vector<8x32xf32>
    %78 = arith.addf %77, %76 : vector<8x32xf32>
    %79 = arith.divf %77, %78 : vector<8x32xf32>
    %80 = vector.extract_strided_slice %55 {offsets = [0, 256], sizes = [8, 32], strides = [1, 1]} : vector<8x384xf32> to vector<8x32xf32>
    %c0_51 = arith.constant 0 : index
    %c256 = arith.constant 256 : index
    %81 = vector.load %arg6[%c0_51, %c256] : memref<2x384xf32, #tpu.memory_space<vmem>>, vector<1x32xf32>
    %82 = vector.broadcast %81 : vector<1x32xf32> to vector<8x32xf32>
    %83 = arith.addf %80, %82 : vector<8x32xf32>
    %84 = vector.extract_strided_slice %57 {offsets = [0, 256], sizes = [8, 32], strides = [1, 1]} : vector<8x384xf32> to vector<8x32xf32>
    %c1_52 = arith.constant 1 : index
    %c256_53 = arith.constant 256 : index
    %85 = vector.load %arg6[%c1_52, %c256_53] : memref<2x384xf32, #tpu.memory_space<vmem>>, vector<1x32xf32>
    %86 = vector.broadcast %85 : vector<1x32xf32> to vector<8x32xf32>
    %87 = arith.addf %84, %86 : vector<8x32xf32>
    %88 = arith.mulf %68, %87 : vector<8x32xf32>
    %89 = arith.addf %83, %88 : vector<8x32xf32>
    %90 = math.tanh %89 : vector<8x32xf32>
    %cst_54 = arith.constant 1.000000e+00 : f32
    %91 = vector.broadcast %cst_54 : f32 to vector<8x32xf32>
    %92 = arith.subf %91, %79 : vector<8x32xf32>
    %93 = arith.mulf %92, %90 : vector<8x32xf32>
    %94 = arith.mulf %79, %53 : vector<8x32xf32>
    %95 = arith.addf %93, %94 : vector<8x32xf32>
    %c0_55 = arith.constant 0 : index
    %c0_56 = arith.constant 0 : index
    %96 = vector.load %arg7[%c0_55, %c0_56] : memref<96x256xf32, #tpu.memory_space<vmem>>, vector<64x256xf32>
    %cst_57 = arith.constant dense<0.000000e+00> : vector<8x256xf32>
    %97 = tpu.matmul %51, %96, %cst_57 {dimension_numbers = #tpu.dot_dimension_numbers<[1], [0], [0], [1], [0, 0, 1, 1], [], []>} : vector<8x64xf32>, vector<64x256xf32>, vector<8x256xf32> -> vector<8x256xf32>
    %c64 = arith.constant 64 : index
    %c0_58 = arith.constant 0 : index
    %98 = vector.load %arg7[%c64, %c0_58] : memref<96x256xf32, #tpu.memory_space<vmem>>, vector<32x256xf32>
    %cst_59 = arith.constant dense<0.000000e+00> : vector<8x256xf32>
    %99 = tpu.matmul %95, %98, %cst_59 {dimension_numbers = #tpu.dot_dimension_numbers<[1], [0], [0], [1], [0, 0, 1, 1], [], []>} : vector<8x32xf32>, vector<32x256xf32>, vector<8x256xf32> -> vector<8x256xf32>
    %100 = arith.addf %97, %99 : vector<8x256xf32>
    %c0_60 = arith.constant 0 : index
    %c0_61 = arith.constant 0 : index
    %101 = vector.load %arg8[%c0_60, %c0_61] : memref<1x256xf32, #tpu.memory_space<vmem>>, vector<1x256xf32>
    %102 = vector.broadcast %101 : vector<1x256xf32> to vector<8x256xf32>
    %103 = arith.addf %100, %102 : vector<8x256xf32>
    %cst_62 = arith.constant 0.000000e+00 : f32
    %104 = vector.broadcast %cst_62 : f32 to vector<8x256xf32>
    %105 = arith.maximumf %103, %104 : vector<8x256xf32>
    %c0_63 = arith.constant 0 : index
    %c0_64 = arith.constant 0 : index
    %106 = vector.load %arg9[%c0_63, %c0_64] : memref<256x128xf32, #tpu.memory_space<vmem>>, vector<256x128xf32>
    %cst_65 = arith.constant dense<0.000000e+00> : vector<8x128xf32>
    %107 = tpu.matmul %105, %106, %cst_65 {dimension_numbers = #tpu.dot_dimension_numbers<[1], [0], [0], [1], [0, 0, 1, 1], [], []>} : vector<8x256xf32>, vector<256x128xf32>, vector<8x128xf32> -> vector<8x128xf32>
    %c0_66 = arith.constant 0 : index
    %c0_67 = arith.constant 0 : index
    %108 = vector.load %arg10[%c0_66, %c0_67] : memref<1x128xf32, #tpu.memory_space<vmem>>, vector<1x128xf32>
    %109 = vector.broadcast %108 : vector<1x128xf32> to vector<8x128xf32>
    %110 = arith.addf %107, %109 : vector<8x128xf32>
    %c0_68 = arith.constant 0 : index
    %c0_69 = arith.constant 0 : index
    %111 = vector.load %arg11[%c0_68, %c0_69] : memref<8x128xf32, #tpu.memory_space<vmem>>, vector<8x128xf32>
    tpu.vector_store %arg11[%c0_68, %c0_69], %110 {strides = array<i32>} : memref<8x128xf32, #tpu.memory_space<vmem>>, vector<8x128xf32>,
    %c0_70 = arith.constant 0 : index
    %c0_71 = arith.constant 0 : index
    %c0_72 = arith.constant 0 : index
    %112 = vector.load %arg12[%c0_70, %c0_71, %c0_72] : memref<1x8x32xf32, #tpu.memory_space<vmem>>, vector<1x8x32xf32>
    %113 = vector.shape_cast %112 : vector<1x8x32xf32> to vector<8x32xf32>
    %114 = vector.shape_cast %95 : vector<8x32xf32> to vector<1x8x32xf32>
    tpu.vector_store %arg12[%c0_70, %c0_71, %c0_72], %114 {strides = array<i32>} : memref<1x8x32xf32, #tpu.memory_space<vmem>>, vector<1x8x32xf32>,
    return
  }
}

</mosaic_0001>

<bundles_post_ra>
// kernel: tpu_custom_call.1
= control target key start
LH: loop header
LB: loop body
LE: loop exit
PB: predicated region body
PF: predicated region fallthrough
CT: control target
= control target key end

     0   :  { %18 = vsyncpa [#allocation6], 0  ;;  %s1557_s0 = inlined_call_operand.vmem [shape: s32[8], index: 0, kind: input, shape index: {}]   ;;  %s1558_s1 = inlined_call_operand.vmem [shape: f32[64,32], index: 1, kind: input, shape index: {}]   ;;  %s1559_s2 = inlined_call_operand.vmem [shape: f32[1,8,32], index: 2, kind: input, shape index: {}]   ;;  %s1560_s3 = inlined_call_operand.hbm [shape: f32[1,8,32], index: 3, kind: input, shape index: {}, may-alias: {3,12}]   ;;  %s1561_s4 = inlined_call_operand.hbm [shape: f32[64,384], index: 4, kind: input, shape index: {}]   ;;  %s1562_s5 = inlined_call_operand.vmem [shape: f32[32,384], index: 5, kind: input, shape index: {}]   ;;  %s1563_s6 = inlined_call_operand.vmem [shape: f32[2,384], index: 6, kind: input, shape index: {}]   ;;  %s1564_s7 = inlined_call_operand.hbm [shape: f32[96,256], index: 7, kind: input, shape index: {}]   ;;  %s1565_s8 = inlined_call_operand.vmem [shape: f32[1,256], index: 8, kind: input, shape index: {}]   ;;  %s1566_s9 = inlined_call_operand.hbm [shape: f32[256,128], index: 9, kind: input, shape index: {}]   ;;  %s1567_s10 = inlined_call_operand.vmem [shape: f32[1,128], index: 10, kind: input, shape index: {}]   ;;  %s1568_s11 = inlined_call_operand.hbm [shape: f32[8,128], index: 11, kind: output, shape index: {0}]   ;;  %s1569_s12 = inlined_call_operand.hbm [shape: f32[1,8,32], index: 12, kind: output, shape index: {1}, may-alias: {3,12}]  }
   0x1   :  { %19 = vsyncpa [#allocation4], 0 }
   0x2   :  { %20 = vsyncpa [#allocation9], 0 }
   0x3   :  { %21 = vsyncpa [#allocation12], 0 }
   0x4   :  { %22 = vsyncpa [#allocation5], 0 }
   0x5   :  { %23 = vsyncpa [#allocation15], 0  ;;  %s1249_s21 = smov [#allocation8]   ;;  %s30_s25 = sshll.u32 %s1557_s0, 4  ;;  %s31_s25 = int_to_ptr.vmem [resolvable:$true] %s30_s25 }
   0x6   :  { %s53_s22 = sshll.u32 %s1249_s21, 4  ;;  %s1093_s28 = scalar_lea.hbm %s1561_s4, 3072  ;;  %s54_s22 = int_to_ptr.vmem [resolvable:$true] %s53_s22 }
   0x7   :  { %p1094_p0 = scmp.ne.s32.totalorder %s1561_s4, %s1093_s28  ;;  %p1097_p1 = scmp.lt.u32.totalorder %s1093_s28, %s1561_s4 }
   0x9   :  { %p1099_p2 = pnand %p1097_p1, %p1094_p0 }
   0xb   :  { %1102 = shalt.err (!%p1099_p2)
}
   0xc   :  { %s1103_s15 = scalar_lea.vmem %s54_s22, 3072  ;;  %p1108_p4 = scmp.lt.s32.totalorder %s54_s22, %s54_s22 }
   0xd   :  { %p1104_p3 = scmp.ne.s32.totalorder %s54_s22, %s1103_s15  ;;  %p1109_p5 = scmp.lt.s32.totalorder %s1103_s15, %s1103_s15 }
   0xf   :  { %p1110_p6 = por %p1109_p5, %p1108_p4 }
  0x11   :  { %p1111_p7 = pnand %p1110_p6, %p1104_p3 }
  0x13   :  { %1114 = shalt.err (!%p1111_p7)
}
  0x14   :  { %s1250_s0 = smov 384   ;;  %s1251_s16 = smov 24  }
  0x15   :  { %59 = dma.hbm_to_vmem [thread:$0]  %s1561_s4, 3072, %s54_s22, [#allocation9], %s1250_s0, %s1250_s0, %s1251_s16  }
  0x16   :  { %s1115_s19 = scalar_lea.vmem %s31_s25, 16  ;;  %p1120_p9 = scmp.lt.s32.totalorder %s31_s25, %s31_s25 }
  0x17   :  { %p1116_p8 = scmp.ne.s32.totalorder %s31_s25, %s1115_s19  ;;  %p1121_p10 = scmp.lt.s32.totalorder %s1115_s19, %s1115_s19 }
  0x19   :  { %p1122_p11 = por %p1121_p10, %p1120_p9 }
  0x1b   :  { %p1123_p12 = pnand %p1122_p11, %p1116_p8 }
  0x1d   :  { %1126 = shalt.err (!%p1123_p12)
}
  0x1e   :  { %s1252_s20 = smov [#allocation3]   ;;  %s1253_s21 = smov [#allocation7]  }
  0x1f   :  { %33 = dma.vmem_to_smem %s31_s25, 16, %s1252_s20, [#allocation6]  }
  0x20   :  { %s44_s23 = sshll.u32 %s1253_s21, 4  ;;  %s1254_s24 = smov [#allocation10]   ;;  %s45_s23 = int_to_ptr.vmem [resolvable:$true] %s44_s23 }
  0x21   :  { %s69_s26 = sshll.u32 %s1254_s24, 4  ;;  %s1127_s4 = scalar_lea.hbm %s1560_s3, 128  ;;  %s1346_s26 = int_to_ptr.vmem [resolvable:$true] %s69_s26 }
  0x22   :  { %p1128_p13 = scmp.ne.s32.totalorder %s1560_s3, %s1127_s4  ;;  %p1131_p0 = scmp.lt.u32.totalorder %s1127_s4, %s1560_s3 }
  0x24   :  { %p1133_p1 = pnand %p1131_p0, %p1128_p13 }
  0x26   :  { %1136 = shalt.err (!%p1133_p1)
}
  0x27   :  { %s1137_s25 = scalar_lea.vmem %s45_s23, 128  ;;  %p1142_p3 = scmp.lt.s32.totalorder %s45_s23, %s45_s23 }
  0x28   :  { %p1138_p2 = scmp.ne.s32.totalorder %s45_s23, %s1137_s25  ;;  %p1143_p4 = scmp.lt.s32.totalorder %s1137_s25, %s1137_s25 }
  0x2a   :  { %p1144_p5 = por %p1143_p4, %p1142_p3 }
  0x2c   :  { %p1145_p6 = pnand %p1144_p5, %p1138_p2 }
  0x2e   :  { %1148 = shalt.err (!%p1145_p6)
}
  0x2f   :  { %47 = dma.hbm_to_vmem [thread:$0]  %s1560_s3, 128, %s45_s23, [#allocation4]  }
  0x30   :  { %s1149_s17 = scalar_lea.hbm %s1564_s7, 3072 }
  0x31   :  { %p1150_p7 = scmp.ne.s32.totalorder %s1564_s7, %s1149_s17  ;;  %p1153_p8 = scmp.lt.u32.totalorder %s1149_s17, %s1564_s7 }
  0x33   :  { %p1155_p9 = pnand %p1153_p8, %p1150_p7 }
  0x35   :  { %1158 = shalt.err (!%p1155_p9)
}
  0x36   :  { %s1159_s24 = scalar_lea.vmem %s1346_s26, 3072  ;;  %p1164_p11 = scmp.lt.s32.totalorder %s1346_s26, %s1346_s26 }
  0x37   :  { %p1160_p10 = scmp.ne.s32.totalorder %s1346_s26, %s1159_s24  ;;  %p1165_p12 = scmp.lt.s32.totalorder %s1159_s24, %s1159_s24 }
  0x39   :  { %p1166_p13 = por %p1165_p12, %p1164_p11 }
  0x3b   :  { %p1167_p0 = pnand %p1166_p13, %p1160_p10 }
  0x3d   :  { %1170 = shalt.err (!%p1167_p0)
}
  0x3e   :  { %s1255_s3 = smov 256   ;;  %s1256_s23 = smov 16  }
  0x3f   :  { %75 = dma.hbm_to_vmem [thread:$0]  %s1564_s7, 3072, %s1346_s26, [#allocation9], %s1255_s3, %s1255_s3, %s1256_s23  }
  0x40   :  { %s1257_s4 = smov [#allocation11]   ;;  %s1171_s13 = scalar_lea.hbm %s1566_s9, 4096 }
  0x41   :  { %s83_s22 = sshll.u32 %s1257_s4, 4  ;;  %p1172_p1 = scmp.ne.s32.totalorder %s1566_s9, %s1171_s13  ;;  %s84_s22 = int_to_ptr.vmem [resolvable:$true] %s83_s22 }
  0x42   :  { %p1175_p2 = scmp.lt.u32.totalorder %s1171_s13, %s1566_s9 }
  0x44   :  { %p1177_p3 = pnand %p1175_p2, %p1172_p1 }
  0x46   :  { %1180 = shalt.err (!%p1177_p3)
}
  0x47   :  { %s1181_s16 = scalar_lea.vmem %s84_s22, 4096  ;;  %p1186_p5 = scmp.lt.s32.totalorder %s84_s22, %s84_s22 }
  0x48   :  { %p1182_p4 = scmp.ne.s32.totalorder %s84_s22, %s1181_s16  ;;  %p1187_p6 = scmp.lt.s32.totalorder %s1181_s16, %s1181_s16 }
  0x4a   :  { %p1188_p7 = por %p1187_p6, %p1186_p5 }
  0x4c   :  { %p1189_p8 = pnand %p1188_p7, %p1182_p4 }
  0x4e   :  { %1192 = shalt.err (!%p1189_p8)
}
  0x4f   :  { %s1258_s7 = smov 128   ;;  %s1259_s26 = smov 8  }
  0x50   :  { %89 = dma.hbm_to_vmem [thread:$0]  %s1566_s9, 4096, %s84_s22, [#allocation12], %s1258_s7, %s1258_s7, %s1259_s26  }
  0x51   :  { %1237 = dma.done.wait [#allocation6], 16  }
  0x52   :  { %1238 = vsyncadd [#allocation6], 4294967280 }
  0x53   :  { %1239 = dma.done.wait [#allocation4], 128  }
  0x54   :  { %1240 = vsyncadd [#allocation4], 4294967168 }
  0x55   :  { %1241 = dma.done.wait [#allocation9], 6144  }
  0x56   :  { %1242 = vsyncadd [#allocation9], 4294961152 }
  0x57   :  { %1243 = dma.done.wait [#allocation12], 4096  }
  0x58   :  { %1244 = vsyncadd [#allocation12], 4294963200 }
  0x59   :  { %107 = sfence }
  0x5a   :  { %v149_v0 = vld [vmem:[%s1559_s2] sm:$0xff]  ;;  %v159_v1 = vld [vmem:[#allocation8 + $0x8] sm:$0xff]  ;;  %v162_v2 = vld [vmem:[#allocation8 + $0x20] sm:$0xff]  ;;  %s1260_s21 = smov 32   ;;  %v1261_v6 = vmov 0.0|0.0   ;;  %s1393_s9 = sld [smem:[#allocation3]] }
  0x5b   :  { %151 = vrot.lane.b32.xlu0 %v149_v0, %s1260_s21  ;;  %v964_v3 = vpack.c.bf16 %v162_v2, %v159_v1  ;;  %v158_v4 = vld [vmem:[#allocation8] sm:$0xff]  ;;  %v161_v5 = vld [vmem:[#allocation8 + $0x18] sm:$0xff]  ;;  %980 = vmatprep.subr.bf16.mxu1 %v1261_v6  ;;  %v160_v7 = vld [vmem:[#allocation8 + $0x10] sm:$0xff]  ;;  %s1395_s24 = sld [smem:[#allocation3 + $0x1]]  ;;  %s1397_s2 = sld [smem:[#allocation3 + $0x2]]  ;;  %v1262_v17 = vmov 0.0  }
  0x5c   :  { %v966_v8 = vpack.c.bf16 %v161_v5, %v158_v4  ;;  %v163_v9 = vld [vmem:[#allocation8 + $0x28] sm:$0xff]  ;;  %v165_v10 = vld [vmem:[#allocation8 + $0x38] sm:$0xff]  ;;  %v168_v11 = vld [vmem:[#allocation8 + $0x50] sm:$0xff]  ;;  %250 = vmatprep.mubr.f32.mxu0 %v1262_v17  ;;  %s1400_s3 = sld [smem:[#allocation3 + $0x3]]  ;;  %s1402_s23 = sld [smem:[#allocation3 + $0x4]]  ;;  %vm1263_vm0 = vmmov 0  }
  0x5d   :  { %965 = vmatprep.subr.bf16.mxu0 %v964_v3  ;;  %v981_v12 = vpack.c.bf16 %v163_v9, %v160_v7  ;;  %v968_v13 = vpack.c.bf16 %v168_v11, %v165_v10  ;;  %v164_v14 = vld [vmem:[#allocation8 + $0x30] sm:$0xff]  ;;  %v167_v15 = vld [vmem:[#allocation8 + $0x48] sm:$0xff]  ;;  %v166_v16 = vld [vmem:[#allocation8 + $0x40] sm:$0xff]  ;;  %950 = vmatprep.mubr.msk.f32.mxu1 %vm1263_vm0, %v1262_v17  ;;  %s1406_s27 = sld [smem:[#allocation3 + $0x5]]  ;;  %s1408_s28 = sld [smem:[#allocation3 + $0x6]]  ;;  %vm112_vm1 = vcmask 253952  }
  0x5e   :  { %967 = vmatpush1.bf16.msra.mxu0 %v966_v8  ;;  %v970_v18 = vpack.c.bf16 %v167_v15, %v164_v14  ;;  %v169_v19 = vld [vmem:[#allocation8 + $0x58] sm:$0xff]  ;;  %v171_v20 = vld [vmem:[#allocation8 + $0x68] sm:$0xff]  ;;  %v174_v22 = vld [vmem:[#allocation8 + $0x80] sm:$0xff]  ;;  %s1411_s4 = sld [smem:[#allocation3 + $0x7]]  ;;  %vm154_vm2 = vcmask 523520   ;;  %vm182_vm3 = vcmask 523264  }
  0x5f   :  { %982 = vmatpush3.bf16.msra.mxu1 %v981_v12  ;;  %969 = vmatprep.subr.bf16.mxu0 %v968_v13  ;;  %v984_v21 = vpack.c.bf16 %v169_v19, %v166_v16  ;;  %v170_v23 = vld [vmem:[#allocation8 + $0x60] sm:$0xff]  ;;  %v972_v24 = vpack.c.bf16 %v174_v22, %v171_v20  ;;  %v173_v25 = vld [vmem:[#allocation8 + $0x78] sm:$0xff]  ;;  %v172_v26 = vld [vmem:[#allocation8 + $0x70] sm:$0xff]  ;;  %vm339_vm4 = vcmask 261120  }
  0x60   :  { %983 = vmatprep.subr.bf16.mxu1 %v1261_v6  ;;  %v175_v27 = vld [vmem:[#allocation8 + $0x88] sm:$0xff]  ;;  %s109_s30 = scalar_lea.vmem %s1558_s1, %s1393_s9  ;;  %v177_v28 = vld [vmem:[#allocation8 + $0x98] sm:$0xff]  ;;  %v180_v29 = vld [vmem:[#allocation8 + $0xb0] sm:$0xff]  ;;  %v974_v31 = vpack.c.bf16 %v173_v25, %v170_v23 }
  0x61   :  { %v110_v30 = vld [vmem:[%s109_s30] sm:$0x1]  ;;  %s115_s14 = scalar_lea.vmem %s1558_s1, %s1395_s24  ;;  %v179_v33 = vld [vmem:[#allocation8 + $0xa8] sm:$0xff]  ;;  %s120_s16 = scalar_lea.vmem %s1558_s1, %s1397_s2  ;;  %v987_v36 = vpack.c.bf16 %v175_v27, %v172_v26  ;;  %v976_v37 = vpack.c.bf16 %v180_v29, %v177_v28  ;;  %v178_v38 = vld [vmem:[#allocation8 + $0xa0] sm:$0xff] }
  0x62   :  { %971 = vmatpush1.bf16.msra.mxu0 %v970_v18  ;;  %v176_v32 = vld [vmem:[#allocation8 + $0x90] sm:$0xff]  ;;  %v111_v34 = vmax.f32 %v110_v30, 0.0  ;;  %v181_v39 = vld [vmem:[#allocation8 + $0xb8] sm:$0xff]  ;;  %s125_s17 = scalar_lea.vmem %s1558_s1, %s1400_s3  ;;  %s130_s20 = scalar_lea.vmem %s1558_s1, %s1402_s23  ;;  %v330_v60 = vld [vmem:[%s1562_s5 + $0x18] sm:$0xff] }
  0x63   :  { %985 = vmatpush3.bf16.msra.mxu1 %v984_v21  ;;  %v116_v35 = vld [vmem:[%s115_s14] sm:$0x1]  ;;  %973 = vmatprep.subr.bf16.mxu0 %v972_v24  ;;  %v328_v42 = vld [vmem:[%s1562_s5 + $0x8] sm:$0xff]  ;;  %s135_s29 = scalar_lea.vmem %s1558_s1, %s1406_s27  ;;  %s140_s13 = scalar_lea.vmem %s1558_s1, %s1408_s28  ;;  %v978_v51 = vpack.c.bf16 %v179_v33, %v176_v32  ;;  %v990_v55 = vpack.c.bf16 %v181_v39, %v178_v38  ;;  %v334_v61 = vld [vmem:[%s1562_s5 + $0x38] sm:$0xff] }
  0x64   :  { %v117_v40 = vmax.f32 %v116_v35, 0.0  ;;  %v121_v41 = vld [vmem:[%s120_s16] sm:$0x1]  ;;  %986 = vmatprep.subr.bf16.mxu1 %v1261_v6  ;;  %113 = vst.msk [vmem:[#allocation2] sm:$0x1] %vm112_vm1, %v111_v34  ;;  %s145_s15 = scalar_lea.vmem %s1558_s1, %s1411_s4  ;;  %v337_v62 = vld [vmem:[%s1562_s5 + $0x50] sm:$0xff] }
  0x65   :  { %v331_v43 = vld [vmem:[%s1562_s5 + $0x20] sm:$0xff]  ;;  %v122_v44 = vmax.f32 %v121_v41, 0.0  ;;  %v329_v63 = vld [vmem:[%s1562_s5 + $0x10] sm:$0xff]  ;;  %v332_v0 = vld [vmem:[%s1562_s5 + $0x28] sm:$0xff]  ;;  %v996_v2 = vpack.c.bf16 %v337_v62, %v334_v61  ;;  %s1264_s4 = smov [#allocation14]  }
  0x66   :  { %v126_v45 = vld [vmem:[%s125_s17] sm:$0x1]  ;;  %118 = vst.msk [vmem:[#allocation2 + $0x1] sm:$0x1] %vm112_vm1, %v117_v40  ;;  %975 = vmatpush1.bf16.msra.mxu0 %v974_v31  ;;  %v992_v56 = vpack.c.bf16 %v331_v43, %v328_v42  ;;  %v333_v3 = vld [vmem:[%s1562_s5 + $0x30] sm:$0xff]  ;;  %v336_v4 = vld [vmem:[%s1562_s5 + $0x48] sm:$0xff]  ;;  %v1001_v5 = vpack.c.bf16 %v332_v0, %v329_v63 }
  0x67   :  { %v131_v46 = vld [vmem:[%s130_s20] sm:$0x1]  ;;  %v127_v47 = vmax.f32 %v126_v45, 0.0  ;;  %123 = vst.msk [vmem:[#allocation2 + $0x2] sm:$0x1] %vm112_vm1, %v122_v44  ;;  %988 = vmatpush3.bf16.msra.mxu1 %v987_v36  ;;  %977 = vmatprep.subr.bf16.mxu0 %v976_v37  ;;  %v338_v9 = vld [vmem:[%s1562_s5 + $0x58] sm:$0xff]  ;;  %v998_v10 = vpack.c.bf16 %v336_v4, %v333_v3 }
  0x68   :  { %v132_v48 = vmax.f32 %v131_v46, 0.0  ;;  %v136_v49 = vld [vmem:[%s135_s29] sm:$0x1]  ;;  %989 = vmatprep.subr.bf16.mxu1 %v1261_v6  ;;  %v1502_v12 = vld [vmem:[#allocation7] sm:$0xff]  ;;  %v546_v13 = vld [vmem:[#allocation10 + $0x88] sm:$0xff]  ;;  %s841_s0 = sshll.u32 %s1264_s4, 4  ;;  %s842_s0 = int_to_ptr.vmem [resolvable:$true] %s841_s0 }
  0x69   :  { %v141_v50 = vld [vmem:[%s140_s13] sm:$0x1]  ;;  %v137_v52 = vmax.f32 %v136_v49, 0.0  ;;  %128 = vst.msk [vmem:[#allocation2 + $0x3] sm:$0x1] %vm112_vm1, %v127_v47  ;;  %v548_v14 = vld [vmem:[#allocation10 + $0x98] sm:$0xff]  ;;  %p1198_p10 = scmp.lt.s32.totalorder %s842_s0, %s842_s0 }
  0x6a   :  { %v142_v53 = vmax.f32 %v141_v50, 0.0  ;;  %v146_v54 = vld [vmem:[%s145_s15] sm:$0x1]  ;;  %133 = vst.msk [vmem:[#allocation2 + $0x4] sm:$0x1] %vm112_vm1, %v132_v48  ;;  %979 = vmatpush1.bf16.msra.mxu0 %v978_v51  ;;  %v545_v15 = vld [vmem:[#allocation10 + $0x80] sm:$0xff] }
  0x6b   :  { %v147_v57 = vmax.f32 %v146_v54, 0.0  ;;  %138 = vst.msk [vmem:[#allocation2 + $0x5] sm:$0x1] %vm112_vm1, %v137_v52  ;;  %991 = vmatpush3.bf16.msra.mxu1 %v990_v55  ;;  %993 = vmatprep.subr.bf16.mxu0 %v992_v56  ;;  %v327_v59 = vld [vmem:[%s1562_s5] sm:$0xff]  ;;  %v550_v18 = vld [vmem:[#allocation10 + $0xa8] sm:$0xff]  ;;  %v552_v19 = vld [vmem:[#allocation10 + $0xb8] sm:$0xff] }
  0x6c   :  { %143 = vst.msk [vmem:[#allocation2 + $0x6] sm:$0x1] %vm112_vm1, %v142_v53  ;;  %1000 = vmatprep.subr.bf16.mxu1 %v1261_v6  ;;  %v994_v1 = vpack.c.bf16 %v330_v60, %v327_v59  ;;  %v335_v8 = vld [vmem:[%s1562_s5 + $0x40] sm:$0xff]  ;;  %v1010_v21 = vpack.c.bf16 %v552_v19, %v550_v18  ;;  %v549_v22 = vld [vmem:[#allocation10 + $0xa0] sm:$0xff]  ;;  %v530_v24 = vld [vmem:[#allocation10 + $0x8] sm:$0xff]  ;;  %s1193_s16 = scalar_lea.vmem %s842_s0, 128 }
  0x6d   :  { %148 = vst.msk [vmem:[#allocation2 + $0x7] sm:$0x1] %vm112_vm1, %v147_v57  ;;  %v1004_v11 = vpack.c.bf16 %v338_v9, %v335_v8  ;;  %v547_v16 = vld [vmem:[#allocation10 + $0x90] sm:$0xff]  ;;  %v532_v25 = vld [vmem:[#allocation10 + $0x18] sm:$0xff]  ;;  %v730_v28 = vld [vmem:[#allocation11 + $0x80] sm:$0xff]  ;;  %p1194_p9 = scmp.ne.s32.totalorder %s842_s0, %s1193_s16  ;;  %p1199_p11 = scmp.lt.s32.totalorder %s1193_s16, %s1193_s16 }
  0x6e   :  { %v1008_v20 = vpack.c.bf16 %v547_v16, %v545_v15  ;;  %v551_v23 = vld [vmem:[#allocation10 + $0xb0] sm:$0xff]  ;;  %v1014_v27 = vpack.c.bf16 %v532_v25, %v530_v24  ;;  %v731_v29 = vld [vmem:[#allocation11 + $0x88] sm:$0xff]  ;;  %v714_v30 = vld [vmem:[#allocation11] sm:$0xff] }
  0x6f   :  { %v1012_v26 = vpack.c.bf16 %v551_v23, %v549_v22  ;;  %v1030_v31 = vpack.c.bf16 %v731_v29, %v730_v28  ;;  %v715_v32 = vld [vmem:[#allocation11 + $0x8] sm:$0xff]  ;;  %v732_v33 = vld [vmem:[#allocation11 + $0x90] sm:$0xff]  ;;  %v733_v34 = vld [vmem:[#allocation11 + $0x98] sm:$0xff]  ;;  %p1200_p12 = por %p1199_p11, %p1198_p10 }
  0x70   :  { %v1032_v35 = vpack.c.bf16 %v715_v32, %v714_v30  ;;  %v1034_v36 = vpack.c.bf16 %v733_v34, %v732_v33  ;;  %v716_v37 = vld [vmem:[#allocation11 + $0x10] sm:$0xff]  ;;  %v717_v38 = vld [vmem:[#allocation11 + $0x18] sm:$0xff]  ;;  %v734_v39 = vld [vmem:[#allocation11 + $0xa0] sm:$0xff] }
  0x71   :  { %v735_v40 = vld [vmem:[#allocation11 + $0xa8] sm:$0xff]  ;;  %v1036_v41 = vpack.c.bf16 %v717_v38, %v716_v37  ;;  %v718_v43 = vld [vmem:[#allocation11 + $0x20] sm:$0xff]  ;;  %v736_v45 = vld [vmem:[#allocation11 + $0xb0] sm:$0xff]  ;;  %p1201_p13 = pnand %p1200_p12, %p1194_p9 }
  0x72   :  { %v1038_v42 = vpack.c.bf16 %v735_v40, %v734_v39  ;;  %v719_v44 = vld [vmem:[#allocation11 + $0x28] sm:$0xff]  ;;  %v737_v46 = vld [vmem:[#allocation11 + $0xb8] sm:$0xff]  ;;  %v720_v49 = vld [vmem:[#allocation11 + $0x30] sm:$0xff] }
  0x73   :  { %v1040_v47 = vpack.c.bf16 %v719_v44, %v718_v43  ;;  %v1042_v48 = vpack.c.bf16 %v737_v46, %v736_v45  ;;  %v721_v50 = vld [vmem:[#allocation11 + $0x38] sm:$0xff]  ;;  %v738_v51 = vld [vmem:[#allocation11 + $0xc0] sm:$0xff]  ;;  %v739_v52 = vld [vmem:[#allocation11 + $0xc8] sm:$0xff] }
  0x74   :  { %v1044_v53 = vpack.c.bf16 %v721_v50, %v720_v49  ;;  %v1046_v54 = vpack.c.bf16 %v739_v52, %v738_v51  ;;  %v722_v55 = vld [vmem:[#allocation11 + $0x40] sm:$0xff]  ;;  %v723_v56 = vld [vmem:[#allocation11 + $0x48] sm:$0xff]  ;;  %v740_v57 = vld [vmem:[#allocation11 + $0xd0] sm:$0xff] }
  0x75   :  { %v1048_v59 = vpack.c.bf16 %v723_v56, %v722_v55  ;;  %v724_v61 = vld [vmem:[#allocation11 + $0x50] sm:$0xff]  ;;  %v725_v62 = vld [vmem:[#allocation11 + $0x58] sm:$0xff]  ;;  %v742_v63 = vld [vmem:[#allocation11 + $0xe0] sm:$0xff] }
  0x76   :  { %v743_v0 = vld [vmem:[#allocation11 + $0xe8] sm:$0xff]  ;;  %v880_v24 = vld [vmem:[%s1563_s6 + $0x4] ss:$0 sm:$0xff]  ;;  %v540_v44 = vld [vmem:[#allocation10 + $0x58] sm:$0xff] }
  0x77   :  { %v531_v32 = vld [vmem:[#allocation10 + $0x10] sm:$0xff]  ;;  %v534_v34 = vld [vmem:[#allocation10 + $0x28] sm:$0xff]  ;;  %v544_v49 = vld [vmem:[#allocation10 + $0x78] sm:$0xff] }
  0x78   :  { %v538_v43 = vld [vmem:[#allocation10 + $0x48] sm:$0xff]  ;;  %v541_v52 = vld [vmem:[#allocation10 + $0x60] sm:$0xff] }
  0x79   :  { %v1022_v46 = vpack.c.bf16 %v540_v44, %v538_v43  ;;  %v727_v55 = vld [vmem:[#allocation11 + $0x68] sm:$0xff] }
  0xcd   :  { %v152_v58 = vpop.permute.xlu0 %151 }
  0xce   :  { %155 = vst.msk [vmem:[#allocation2] sm:$0xff] %vm154_vm2, %v152_v58  ;;  %v741_v58 = vld [vmem:[#allocation11 + $0xd8] sm:$0xff] }
  0xcf   :  { %v1050_v60 = vpack.c.bf16 %v741_v58, %v740_v57  ;;  %v744_v57 = vld [vmem:[#allocation11 + $0xf0] sm:$0xff]  ;;  %v745_v58 = vld [vmem:[#allocation11 + $0xf8] sm:$0xff] }
  0xd5   :  { %v1486_v7 = vld [vmem:[#allocation2] sm:$0xff] }
  0xd6   :  { %872 = vmatmul.mubr.msk.f32.vlgmr.msra.gmra.mrb[0].mxu0 %vm182_vm3, %v1486_v7  ;;  %951 = vmatmul.mubr.msk.f32.vlgmr.msra.gmra.mrb[0].mxu1 %vm182_vm3, %v1486_v7 }
  0xd7   :  { %995 = vmatpush1.bf16.msra.mxu0 %v994_v1  ;;  %407 = vmatprep.mubr.f32.mxu0 %v1262_v17  ;;  %v1052_v1 = vpack.c.bf16 %v725_v62, %v724_v61  ;;  %v729_v61 = vld [vmem:[#allocation11 + $0x78] sm:$0xff] }
  0xd8   :  { %997 = vmatprep.subr.bf16.mxu0 %v996_v2  ;;  %1002 = vmatpush3.bf16.msra.mxu1 %v1001_v5  ;;  %v1054_v2 = vpack.c.bf16 %v743_v0, %v742_v63  ;;  %v876_v5 = vld [vmem:[%s1563_s6] ss:$0 sm:$0xff]  ;;  %v700_v63 = vlaneseq }
  0xd9   :  { %1003 = vmatprep.subr.bf16.mxu1 %v1261_v6  ;;  %961 = vmatprep.mubr.msk.f32.mxu1 %vm1263_vm0, %v1262_v17  ;;  %v1006_v6 = vpack.c.bf16 %v548_v14, %v546_v13 }
  0xda   :  { %v701_v0 = vshrl.u32 %v700_v63, 7 }
  0xdb   :  { %999 = vmatpush1.bf16.msra.mxu0 %v998_v10 }
  0xdc   :  { %1005 = vmatpush3.bf16.msra.mxu1 %v1004_v11  ;;  %1007 = vmatprep.subr.bf16.mxu0 %v1006_v6  ;;  %v878_v11 = vld [vmem:[%s1563_s6 + $0x2] ss:$0 sm:$0xff] }
  0xdd   :  { %1031 = vmatprep.subr.bf16.mxu1 %v1030_v31  ;;  %v529_v31 = vld [vmem:[#allocation10] sm:$0xff] }
  0xde   :  { %874 = vmatmul.mubr.msk.f32.vlgmr.msra.gmra.mrb[0].mxu0 %vm339_vm4, %v1502_v12  ;;  %v1016_v38 = vpack.c.bf16 %v531_v32, %v529_v31 }
  0xdf   :  { %962 = vmatmul.mubr.msk.f32.vlgmr.msra.gmra.mrb[2].mxu1 %vm339_vm4, %v1502_v12  ;;  %620 = vmatprep.mubr.f32.mxu0 %v1262_v17 }
  0xe0   :  { %1009 = vmatpush1.bf16.msra.mxu0 %v1008_v20  ;;  %1033 = vmatpush3.bf16.msra.mxu1 %v1032_v35  ;;  %v536_v35 = vld [vmem:[#allocation10 + $0x38] sm:$0xff] }
  0xe1   :  { %1011 = vmatprep.subr.bf16.mxu0 %v1010_v21  ;;  %1035 = vmatprep.subr.bf16.mxu1 %v1034_v36  ;;  %v881_v21 = vld [vmem:[%s1563_s6 + $0x5] ss:$0 sm:$0xff]  ;;  %v1018_v40 = vpack.c.bf16 %v536_v35, %v534_v34 }
  0xe4   :  { %1013 = vmatpush1.bf16.msra.mxu0 %v1012_v26  ;;  %1037 = vmatpush3.bf16.msra.mxu1 %v1036_v41  ;;  %v533_v41 = vld [vmem:[#allocation10 + $0x20] sm:$0xff] }
  0xe5   :  { %1015 = vmatprep.subr.bf16.mxu0 %v1014_v27  ;;  %1039 = vmatprep.subr.bf16.mxu1 %v1038_v42  ;;  %v535_v42 = vld [vmem:[#allocation10 + $0x30] sm:$0xff] }
  0xe6   :  { %v1020_v45 = vpack.c.bf16 %v535_v42, %v533_v41 }
  0xe8   :  { %1041 = vmatpush3.bf16.msra.mxu1 %v1040_v47  ;;  %v537_v47 = vld [vmem:[#allocation10 + $0x40] sm:$0xff] }
  0xe9   :  { %1043 = vmatprep.subr.bf16.mxu1 %v1042_v48  ;;  %v539_v48 = vld [vmem:[#allocation10 + $0x50] sm:$0xff] }
  0xea   :  { %v1024_v50 = vpack.c.bf16 %v539_v48, %v537_v47 }
  0xec   :  { %1045 = vmatpush3.bf16.msra.mxu1 %v1044_v53  ;;  %v543_v53 = vld [vmem:[#allocation10 + $0x70] sm:$0xff] }
  0xed   :  { %1047 = vmatprep.subr.bf16.mxu1 %v1046_v54  ;;  %v1028_v54 = vpack.c.bf16 %v543_v53, %v541_v52 }
  0xf0   :  { %1049 = vmatpush3.bf16.msra.mxu1 %v1048_v59  ;;  %v1058_v59 = vpack.c.bf16 %v745_v58, %v744_v57 }
  0xf1   :  { %1051 = vmatprep.subr.bf16.mxu1 %v1050_v60  ;;  %v728_v60 = vld [vmem:[#allocation11 + $0x70] sm:$0xff] }
  0xf2   :  { %v1060_v62 = vpack.c.bf16 %v729_v61, %v728_v60 }
  0xf4   :  { %1053 = vmatpush3.bf16.msra.mxu1 %v1052_v1  ;;  %v702_v1 = vsub.s32 0, %v701_v0 }
  0xf5   :  { %1055 = vmatprep.subr.bf16.mxu1 %v1054_v2  ;;  %v698_v2 = vld [vmem:[%s1565_s8] sm:$0x3] }
 0x1a9   :  { %v323_v3 = vpop.f32.mrb[0].mxu1 }
 0x1aa   :  { %v952_v4 = vpop.f32.mrb[1].mxu1  ;;  %v515_v26 = vadd.f32 %v880_v24, %v323_v3  ;;  %v703_v3 = vrot.slane %v698_v2, %v702_v1 }
 0x1b1   :  { %v409_v8 = vpop.f32.mrb[0].mxu0 }
 0x1b2   :  { %v490_v9 = vadd.f32 %v876_v5, %v409_v8  ;;  %v411_v10 = vpop.f32.mrb[1].mxu0  ;;  %v480_v13 = vpop.f32.mrb[2].mxu1 }
 0x1b3   :  { %v963_v14 = vpop.f32.mrb[3].mxu1  ;;  %v503_v6 = vadd.f32 %v878_v11, %v411_v10  ;;  %v521_v23 = vadd.f32 %v881_v21, %v480_v13 }
 0x1b4   :  { %v877_v15 = vmul.f32 -1.442695, %v490_v9 }
 0x1b5   :  { %v879_v16 = vmul.f32 -1.442695, %v503_v6 }
 0x1b6   :  { %1083 = vpow2.f32 %v877_v15 }
 0x1b7   :  { %1085 = vpow2.f32 %v879_v16 }
 0x1c0   :  { %v1084_v18 = vpop.eup %1083 }
 0x1c1   :  { %v494_v19 = vadd.f32 1.0, %v1084_v18  ;;  %v1086_v20 = vpop.eup %1085 }
 0x1c2   :  { %v507_v22 = vadd.f32 1.0, %v1086_v20 }
 0x1c3   :  { %1087 = vrcp.f32 %v494_v19 }
 0x1c4   :  { %1089 = vrcp.f32 %v507_v22 }
 0x1cd   :  { %v1088_v25 = vpop.eup %1087 }
 0x1ce   :  { %v522_v27 = vmul.f32 %v1088_v25, %v521_v23  ;;  %v1090_v29 = vpop.eup %1089 }
 0x1cf   :  { %v525_v30 = vsub.f32 1.0, %v1090_v29  ;;  %v527_v37 = vmul.f32 %v1090_v29, %v1502_v12  ;;  %v542_v12 = vld [vmem:[#allocation10 + $0x68] sm:$0xff] }
 0x1d0   :  { %v523_v28 = vadd.f32 %v522_v27, %v515_v26  ;;  %v1026_v51 = vpack.c.bf16 %v544_v49, %v542_v12 }
 0x1d2   :  { %1091 = vtanh.f32 %v523_v28 }
 0x1dc   :  { %v1092_v33 = vpop.eup %1091 }
 0x1dd   :  { %v526_v36 = vmul.f32 %v1092_v33, %v525_v30 }
 0x1df   :  { %v528_v39 = vadd.f32 %v527_v37, %v526_v36 }
 0x1e1   :  { %882 = vmatmul.mubr.msk.f32.vlgmr.msra.gmra.mrb[2].mxu0 %vm339_vm4, %v528_v39  ;;  %824 = vst.msk [vmem:[#allocation14] sm:$0xff] %vm339_vm4, %v528_v39 }
 0x1e2   :  { %1017 = vmatpush1.bf16.msra.mxu0 %v1016_v38  ;;  %691 = vmatprep.mubr.f32.mxu0 %v1262_v17  ;;  %v726_v17 = vld [vmem:[#allocation11 + $0x60] sm:$0xff] }
 0x1e3   :  { %1019 = vmatprep.subr.bf16.mxu0 %v1018_v40  ;;  %v1056_v56 = vpack.c.bf16 %v727_v55, %v726_v17 }
 0x1e5   :  { %1057 = vmatpush3.bf16.msra.mxu1 %v1056_v56 }
 0x1e6   :  { %1021 = vmatpush1.bf16.msra.mxu0 %v1020_v45  ;;  %1059 = vmatprep.subr.bf16.mxu1 %v1058_v59 }
 0x1e7   :  { %1023 = vmatprep.subr.bf16.mxu0 %v1022_v46 }
 0x1e9   :  { %1061 = vmatpush3.bf16.msra.mxu1 %v1060_v62 }
 0x1ea   :  { %1025 = vmatpush1.bf16.msra.mxu0 %v1024_v50 }
 0x1eb   :  { %1027 = vmatprep.subr.bf16.mxu0 %v1026_v51 }
 0x1ee   :  { %1029 = vmatpush1.bf16.msra.mxu0 %v1028_v54 }
 0x1f1   :  { %883 = vmatmul.mubr.msk.f32.vlgmr.msra.gmra.mrb[2].mxu0 %vm182_vm3, %v1486_v7  ;;  %v706_v7 = vsub.s32 1, %v701_v0 }
 0x1f3   :  { %v707_v4 = vrot.slane %v698_v2, %v706_v7 }
 0x2c4   :  { %v693_v5 = vpop.f32.mrb[2].mxu0 }
 0x2c5   :  { %v710_v8 = vadd.f32 %v703_v3, %v693_v5  ;;  %v695_v9 = vpop.f32.mrb[3].mxu0 }
 0x2c6   :  { %v711_v10 = vadd.f32 %v707_v4, %v695_v9 }
 0x2c7   :  { %v712_v13 = vmax.f32 %v710_v8, 0.0 }
 0x2c8   :  { %v713_v11 = vmax.f32 %v711_v10, 0.0 }
 0x2ca   :  { %817 = vmatprep.mubr.f32.mxu1 %v713_v11 }
 0x2cb   :  { %818 = vmatmul.mubr.f32.vlgmr.msra.gmra.mrb[4].mxu1 %v712_v13 }
 0x2cc   :  { %1204 = shalt.err (!%p1201_p13)
}
 0x2cd   :  { %s1205_s26 = scalar_lea.hbm %s1569_s12, 128 }
 0x2ce   :  { %p1206_p0 = scmp.ne.s32.totalorder %s1569_s12, %s1205_s26  ;;  %p1209_p1 = scmp.lt.u32.totalorder %s1205_s26, %s1569_s12 }
 0x2d0   :  { %p1211_p2 = pnand %p1209_p1, %p1206_p0 }
 0x2d2   :  { %1214 = shalt.err (!%p1211_p2)
}
 0x2d3   :  { %844 = dma.vmem_to_hbm [thread:$0]  %s842_s0, 128, %s1569_s12, [#allocation15]   ;;  %v884_v6 = vld [vmem:[%s1567_s10] ss:$0 sm:$0xff] }
 0x2d4   :  { %s1265_s3 = smov [#allocation13]  }
 0x2d5   :  { %s831_s22 = sshll.u32 %s1265_s3, 4  ;;  %s832_s22 = int_to_ptr.vmem [resolvable:$true] %s831_s22 }
 0x2d6   :  { %s1215_s29 = scalar_lea.vmem %s832_s22, 128  ;;  %p1220_p4 = scmp.lt.s32.totalorder %s832_s22, %s832_s22 }
 0x2d7   :  { %p1216_p3 = scmp.ne.s32.totalorder %s832_s22, %s1215_s29  ;;  %p1221_p5 = scmp.lt.s32.totalorder %s1215_s29, %s1215_s29 }
 0x2d9   :  { %p1222_p6 = por %p1221_p5, %p1220_p4 }
 0x2db   :  { %p1223_p7 = pnand %p1222_p6, %p1216_p3 }
 0x39e   :  { %v931_v14 = vpop.f32.mrb[4].mxu1 }
 0x39f   :  { %v932_v15 = vpop.f32.mrb[5].mxu1 }
 0x3a0   :  { %v933_v16 = vadd.f32 %v932_v15, %v931_v14 }
 0x3a2   :  { %v820_v18 = vadd.f32 %v933_v16, %v884_v6 }
 0x3a4   :  { %823 = vst [vmem:[#allocation13] sm:$0xff] %v820_v18 }
 0x3a5   :  { %1226 = shalt.err (!%p1223_p7)
}
 0x3a6   :  { %s1227_s5 = scalar_lea.hbm %s1568_s11, 128 }
 0x3a7   :  { %p1228_p8 = scmp.ne.s32.totalorder %s1568_s11, %s1227_s5  ;;  %p1231_p9 = scmp.lt.u32.totalorder %s1227_s5, %s1568_s11 }
 0x3a9   :  { %p1233_p10 = pnand %p1231_p9, %p1228_p8 }
 0x3ab   :  { %1236 = shalt.err (!%p1233_p10)
}
 0x3ac   :  { %834 = dma.vmem_to_hbm [thread:$0]  %s832_s22, 128, %s1568_s11, [#allocation5]  }
 0x3ad   :  { %1245 = dma.done.wait [#allocation5], 128  }
 0x3ae   :  { %1246 = vsyncadd [#allocation5], 4294967168 }
 0x3af   :  { %1247 = dma.done.wait [#allocation15], 128  }
 0x3b0   :  { %1248 = vsyncadd [#allocation15], 4294967168 }
 0x3b1   :  { %851 = vsyncpa [#allocation4], 1 }
 0x3b2   :  { %852 = vsyncpa [#allocation9], 1 }
 0x3b3   :  { %853 = vsyncpa [#allocation12], 1 }
 0x3b4   :  { %854 = vsyncpa [#allocation5], 1 }
 0x3b5   :  { %855 = vsyncpa [#allocation15], 1 }
 0x3b6   :  { %856 = vsyncpa [#allocation6], 1 }

</bundles_post_ra>
